<compile_context>
chip_gen: v6e
topology: v6e:2x2x1
jax: 0.10.0
libtpu: 0.0.40
codegen_flags: <defaults>
</compile_context>

<pallas_src>
import functools

import jax
import jax.numpy as jnp
from jax.experimental import pallas as pl
from jax.experimental.pallas import tpu as pltpu


def _round_up(v, m):
    return -(-v // m) * m


# ------------------------------ fused kernel -------------------------------

def _fused_jrk_kernel(x_ref, kb_ref, w_ref, b_ref, out_ref, *,
                      filter_sizes, D, n_filters, en_dim, n_rels, out_pad):
    F = n_filters
    n_conv = len(filter_sizes)
    tot_cols = sum(filter_sizes) * F           # total conv-weight columns

    x = x_ref[...]                             # [TB, L, D] bf16
    TB, L, _ = x.shape
    # Collapse batch into the MXU M dimension (layout no-op: L == 8 sublanes).
    x2 = x.reshape(TB * L, D)

    # --- CNN encoder: ONE matmul over all (filter, tap) pairs --------------
    w_all = w_ref[0:D, 0:tot_cols]             # bf16 [D, sum(k)*F]
    ht = jnp.dot(x2, w_all, preferred_element_type=jnp.float32)
    ht3 = ht.reshape(TB, L, tot_cols)          # f32

    pooled = []
    col = 0
    for i, k in enumerate(filter_sizes):
        L_out = L - k + 1
        acc = ht3[:, 0:L_out, col:col + F]     # tap 0 initializes the acc
        for t in range(1, k):                  # static shifted-tap adds
            c0 = col + t * F
            acc = acc + ht3[:, t:t + L_out, c0:c0 + F]
        b_conv = b_ref[0:1, i * F:(i + 1) * F]                 # f32 [1, F]
        h = jnp.maximum(acc + b_conv[:, None, :], 0.0)         # bias + ReLU
        pooled.append(jnp.max(h, axis=1))                      # max over time
        col += k * F
    feat = pooled[0] if n_conv == 1 else jnp.concatenate(pooled, axis=-1)

    # --- encoder head: tanh projection + softmax over relations (f32) ------
    fdim = n_conv * F
    w1 = w_ref[0:fdim, tot_cols:tot_cols + en_dim]             # bf16
    b1 = b_ref[0:1, fdim:fdim + en_dim]                        # f32
    reprs = jnp.tanh(jnp.dot(feat.astype(jnp.bfloat16), w1,
                             preferred_element_type=jnp.float32) + b1)
    w2 = w_ref[0:en_dim, tot_cols + en_dim:tot_cols + en_dim + n_rels]
    b2 = b_ref[0:1, fdim + en_dim:fdim + en_dim + n_rels]
    logits = jnp.dot(reprs.astype(jnp.bfloat16), w2,
                     preferred_element_type=jnp.float32) + b2
    m = jnp.max(logits, axis=1, keepdims=True)
    e = jnp.exp(logits - m)
    p = e / jnp.sum(e, axis=1, keepdims=True)  # exact reciprocal (cold path)
    p_not_na = 1.0 - p[:, 0:1]                 # P(not NA)
    p_rel = p[:, 1:]                           # P(rel | considered)

    # --- JRK head: sigmoid(kb rows); probs = sum(sig(kb)[:,1:] * p_rel) ----
    epr = 1.0 / (1.0 + jnp.exp(-kb_ref[...]))  # sigmoid, exact, f32
    probs = jnp.sum(epr[:, 1:] * p_rel, axis=1, keepdims=True)

    # --- pack everything into one lane-dense bf16 [TB, out_pad] slab -------
    used = en_dim + 1 + (n_rels - 1) + n_rels + 1
    pieces = [reprs, p_not_na, p_rel, epr, probs]
    if out_pad > used:
        pieces.append(jnp.zeros((TB, out_pad - used), jnp.float32))
    out_ref[...] = jnp.concatenate(pieces, axis=-1).astype(out_ref.dtype)


# --------------------------- wrapper / packing ------------------------------

def _pack_params(params, D):
    """Pack all matmul weights into one bf16 slab and all biases into one f32
    slab (2 constant-index kernel inputs instead of 8).  In production this
    would be pre-packed once; it is a handful of tiny ops here."""
    filter_sizes = tuple(params["filter_sizes"])
    F = params["conv"][0][0].shape[1]
    n_conv = len(filter_sizes)
    en_dim = params["w1"].shape[1]
    n_rels = params["w2"].shape[1]
    tot_cols = sum(filter_sizes) * F

    w_rows = _round_up(max(D, n_conv * F, en_dim), 8)
    w_cols = _round_up(tot_cols + en_dim + n_rels, 128)
    w_slab = jnp.zeros((w_rows, w_cols), jnp.float32)
    col = 0
    for k, (w, _) in zip(filter_sizes, params["conv"]):
        for t in range(k):                     # tap t of this filter size
            w_slab = w_slab.at[0:D, col:col + F].set(w[t * D:(t + 1) * D, :])
            col += F
    w_slab = w_slab.at[0:n_conv * F, col:col + en_dim].set(params["w1"])
    w_slab = w_slab.at[0:en_dim,
                       col + en_dim:col + en_dim + n_rels].set(params["w2"])
    w_slab = w_slab.astype(jnp.bfloat16)

    b_cols = _round_up(n_conv * F + en_dim + n_rels, 128)
    b_slab = jnp.zeros((1, b_cols), jnp.float32)
    conv_b = jnp.concatenate([b for (_, b) in params["conv"]], axis=-1)
    b_slab = b_slab.at[0:1, 0:n_conv * F].set(conv_b)
    b_slab = b_slab.at[0:1, n_conv * F:n_conv * F + en_dim].set(params["b1"])
    b_slab = b_slab.at[0:1, n_conv * F + en_dim:
                            n_conv * F + en_dim + n_rels].set(params["b2"])
    return w_slab, b_slab


def jrk_fused_call(x, kb_rows, params):
    B, L, D = x.shape
    filter_sizes = tuple(params["filter_sizes"])
    F = params["conv"][0][0].shape[1]
    en_dim = params["w1"].shape[1]
    n_rels = params["w2"].shape[1]
    used = en_dim + 1 + (n_rels - 1) + n_rels + 1
    out_pad = _round_up(max(used, 128), 128)   # lane-dense last dim

    w_slab, b_slab = _pack_params(params, D)

    # Batch tile: exact single block for tiny batches (no padded tail work);
    # otherwise >=2 blocks so both v7x TensorCores get work, multiple of 16,
    # capped at 512 (per-step VMEM ~1-2 MiB << scoped default everywhere).
    if B <= 16:
        TB = B
    else:
        TB = min(512, _round_up(pl.cdiv(B, 2), 16))
    grid = (pl.cdiv(B, TB),)

    kernel = functools.partial(
        _fused_jrk_kernel, filter_sizes=filter_sizes, D=D, n_filters=F,
        en_dim=en_dim, n_rels=n_rels, out_pad=out_pad)

    slab = pl.pallas_call(
        kernel,
        grid=grid,
        out_shape=jax.ShapeDtypeStruct((B, out_pad), jnp.bfloat16),
        in_specs=[
            pl.BlockSpec((TB, L, D), lambda i: (i, 0, 0)),      # x (bf16)
            pl.BlockSpec((TB, n_rels), lambda i: (i, 0)),       # kb rows (f32)
            pl.BlockSpec(w_slab.shape, lambda i: (0, 0)),       # weight slab
            pl.BlockSpec(b_slab.shape, lambda i: (0, 0)),       # bias slab
        ],
        out_specs=pl.BlockSpec((TB, out_pad), lambda i: (i, 0)),
        compiler_params=pltpu.CompilerParams(
            dimension_semantics=("parallel",)),  # megacore / v7x 2-TC split
    )(x, kb_rows, w_slab, b_slab)

    slab = slab.astype(jnp.float32)
    o = 0
    reprs = slab[:, o:o + en_dim]; o += en_dim
    p_not_na = slab[:, o]; o += 1
    p_rel = slab[:, o:o + n_rels - 1]; o += n_rels - 1
    epr = slab[:, o:o + n_rels]; o += n_rels
    probs = slab[:, o]
    return probs, p_not_na, p_rel, reprs, epr


# ------------------------------ forward pass -------------------------------

def jrk_forward(params, inputs):
    # Embedding lookups (glue); x stored in HBM as bf16 (halves kernel input
    # traffic; MXU operands are bf16 anyway).
    we = params["word_embs"][inputs["words"]]          # [B, L, Dw]
    p1 = params["pos1_embs"][inputs["pos1"]]           # [B, L, Dp]
    p2 = params["pos2_embs"][inputs["pos2"]]           # [B, L, Dp]
    x = jnp.concatenate([we, p1, p2], axis=-1).astype(jnp.bfloat16)
    kb_rows = params["ent_pair_rel_scores"][inputs["ent_pair"]].astype(jnp.float32)
    # dropout: identity at inference time.
    return jrk_fused_call(x, kb_rows, params)


# pure-JAX f32 reference for the correctness check
def jrk_forward_ref(params, inputs):
    we = params["word_embs"][inputs["words"]]
    p1 = params["pos1_embs"][inputs["pos1"]]
    p2 = params["pos2_embs"][inputs["pos2"]]
    x = jnp.concatenate([we, p1, p2], axis=-1)
    B, L, D = x.shape
    pooled = []
    for k, (w, b) in zip(params["filter_sizes"], params["conv"]):
        L_out = L - k + 1
        cols = jnp.stack([x[:, t:t + L_out, :] for t in range(k)], axis=2)
        xcol = cols.reshape(B, L_out, k * D)
        h = jnp.maximum(jnp.einsum("blk,kf->blf", xcol, w) + b[None], 0.0)
        pooled.append(jnp.max(h, axis=1))
    feat = jnp.concatenate(pooled, axis=-1)
    reprs = jnp.tanh(feat @ params["w1"] + params["b1"])
    p = jax.nn.softmax(reprs @ params["w2"] + params["b2"], axis=-1)
    p_not_na, p_rel = 1.0 - p[:, 0], p[:, 1:]
    epr = jax.nn.sigmoid(params["ent_pair_rel_scores"][inputs["ent_pair"]])
    probs = jnp.sum(epr[:, 1:] * p_rel, axis=1)
    return probs, p_not_na, p_rel, reprs, epr


# --------------------------------- main -------------------------------------

if __name__ == "__main__":
    # small config
    B, L = 2, 8
    vocab, word_dim = 50, 16
    max_pos, pos_embdim = 20, 4
    n_filters, filter_sizes = 8, [2, 3]
    en_dim, n_rels = 32, 5
    n_ent_pairs = 10
    D = word_dim + 2 * pos_embdim

    key = jax.random.PRNGKey(0)
    ks = jax.random.split(key, 16)

    params = {
        "word_embs": 0.1 * jax.random.normal(ks[0], (vocab, word_dim), jnp.float32),
        "pos1_embs": 0.1 * jax.random.normal(ks[1], (max_pos, pos_embdim), jnp.float32),
        "pos2_embs": 0.1 * jax.random.normal(ks[2], (max_pos, pos_embdim), jnp.float32),
        "filter_sizes": filter_sizes,
        "conv": [(0.1 * jax.random.normal(ks[3 + i], (k * D, n_filters), jnp.float32),
                  0.1 * jax.random.normal(ks[5 + i], (1, n_filters), jnp.float32))
                 for i, k in enumerate(filter_sizes)],
        "w1": 0.1 * jax.random.normal(ks[7], (n_filters * len(filter_sizes), en_dim), jnp.float32),
        "b1": 0.1 * jax.random.normal(ks[8], (1, en_dim), jnp.float32),
        "w2": 0.1 * jax.random.normal(ks[9], (en_dim, n_rels), jnp.float32),
        "b2": 0.1 * jax.random.normal(ks[10], (1, n_rels), jnp.float32),
        # nn.Embedding(len(ent_pair2id), n_rels) with weight.data.fill_(-1)
        "ent_pair_rel_scores": jnp.full((n_ent_pairs, n_rels), -1.0, jnp.float32),
    }

    inputs = {
        "words": jax.random.randint(ks[11], (B, L), 0, vocab, jnp.int32),
        "pos1": jax.random.randint(ks[12], (B, L), 0, max_pos, jnp.int32),
        "pos2": jax.random.randint(ks[13], (B, L), 0, max_pos, jnp.int32),
        "ent_pair": jax.random.randint(ks[14], (B,), 0, n_ent_pairs, jnp.int32),
    }

    probs, p_not_na, p_rel_not_na, reprs, ent_pair_rel = jax.block_until_ready(
        jrk_forward(params, inputs))

    r_probs, r_pnna, r_prel, r_reprs, r_epr = jrk_forward_ref(params, inputs)
    assert probs.shape == (B,) and p_not_na.shape == (B,)
    assert p_rel_not_na.shape == (B, n_rels - 1)
    assert reprs.shape == (B, en_dim) and ent_pair_rel.shape == (B, n_rels)
    # Tolerance covers bf16 MXU operands, bf16 x storage and the bf16 output
    # slab vs. the pure-f32 reference (softmax/sigmoid reciprocals are exact).
    for a, b_ in [(probs, r_probs), (p_not_na, r_pnna), (p_rel_not_na, r_prel),
                  (reprs, r_reprs), (ent_pair_rel, r_epr)]:
        assert jnp.allclose(a, b_, atol=1e-2, rtol=1e-2), "mismatch vs reference"

    print("KERNEL_OK")
</pallas_src>

<mosaic_0001>
module attributes {stable_mosaic.version = 11 : i64} {
  func.func @_fused_jrk_kernel(%arg0: i32, %arg1: memref<2x8x24xbf16, #tpu.memory_space<vmem>>, %arg2: memref<2x5xf32, #tpu.memory_space<vmem>>, %arg3: memref<32x128xbf16, #tpu.memory_space<vmem>>, %arg4: memref<1x128xf32, #tpu.memory_space<vmem>>, %arg5: memref<2x128xbf16, #tpu.memory_space<vmem>>) attributes {dimension_semantics = [#tpu.dimension_semantics<parallel>], iteration_bounds = array<i64: 1>, scalar_prefetch = 0 : i64, scratch_operands = 0 : i64, tpu.core_type = #tpu.core_type<tc>, window_params = [{transform_indices = @transform_0, window_bounds = array<i64: 2, 8, 24>}, {transform_indices = @transform_1, window_bounds = array<i64: 2, 5>}, {pipeline_mode = #tpu.pipeline_mode<synchronous>, transform_indices = @transform_2, window_bounds = array<i64: 32, 128>}, {pipeline_mode = #tpu.pipeline_mode<synchronous>, transform_indices = @transform_3, window_bounds = array<i64: 1, 128>}, {transform_indices = @transform_4, window_bounds = array<i64: 2, 128>}]} {
    %c0 = arith.constant 0 : index
    %c0_0 = arith.constant 0 : index
    %c0_1 = arith.constant 0 : index
    %0 = vector.load %arg1[%c0, %c0_0, %c0_1] : memref<2x8x24xbf16, #tpu.memory_space<vmem>>, vector<2x8x24xbf16>
    %1 = vector.shape_cast %0 : vector<2x8x24xbf16> to vector<16x24xbf16>
    %c0_2 = arith.constant 0 : index
    %c0_3 = arith.constant 0 : index
    %2 = vector.load %arg3[%c0_2, %c0_3] : memref<32x128xbf16, #tpu.memory_space<vmem>>, vector<24x40xbf16>
    %cst = arith.constant dense<0.000000e+00> : vector<16x40xf32>
    %3 = tpu.matmul %1, %2, %cst {dimension_numbers = #tpu.dot_dimension_numbers<[1], [0], [0], [1], [0, 0, 1, 1], [], []>} : vector<16x24xbf16>, vector<24x40xbf16>, vector<16x40xf32> -> vector<16x40xf32>
    %4 = vector.shape_cast %3 : vector<16x40xf32> to vector<2x8x40xf32>
    %5 = vector.extract_strided_slice %4 {offsets = [0, 0, 0], sizes = [2, 7, 8], strides = [1, 1, 1]} : vector<2x8x40xf32> to vector<2x7x8xf32>
    %6 = vector.extract_strided_slice %4 {offsets = [0, 1, 8], sizes = [2, 7, 8], strides = [1, 1, 1]} : vector<2x8x40xf32> to vector<2x7x8xf32>
    %7 = arith.addf %5, %6 : vector<2x7x8xf32>
    %c0_4 = arith.constant 0 : index
    %c0_5 = arith.constant 0 : index
    %8 = vector.load %arg4[%c0_4, %c0_5] : memref<1x128xf32, #tpu.memory_space<vmem>>, vector<1x8xf32>
    %9 = vector.shape_cast %8 : vector<1x8xf32> to vector<1x1x8xf32>
    %10 = vector.broadcast %9 : vector<1x1x8xf32> to vector<2x7x8xf32>
    %11 = arith.addf %7, %10 : vector<2x7x8xf32>
    %cst_6 = arith.constant 0.000000e+00 : f32
    %12 = vector.broadcast %cst_6 : f32 to vector<2x7x8xf32>
    %13 = arith.maximumf %11, %12 : vector<2x7x8xf32>
    %cst_7 = arith.constant dense<0xFF800000> : vector<2x8xf32>
    %14 = vector.multi_reduction <maximumf>, %13, %cst_7 [1] : vector<2x7x8xf32> to vector<2x8xf32>
    %15 = vector.extract_strided_slice %4 {offsets = [0, 0, 16], sizes = [2, 6, 8], strides = [1, 1, 1]} : vector<2x8x40xf32> to vector<2x6x8xf32>
    %16 = vector.extract_strided_slice %4 {offsets = [0, 1, 24], sizes = [2, 6, 8], strides = [1, 1, 1]} : vector<2x8x40xf32> to vector<2x6x8xf32>
    %17 = arith.addf %15, %16 : vector<2x6x8xf32>
    %18 = vector.extract_strided_slice %4 {offsets = [0, 2, 32], sizes = [2, 6, 8], strides = [1, 1, 1]} : vector<2x8x40xf32> to vector<2x6x8xf32>
    %19 = arith.addf %17, %18 : vector<2x6x8xf32>
    %c0_8 = arith.constant 0 : index
    %c8 = arith.constant 8 : index
    %20 = vector.load %arg4[%c0_8, %c8] : memref<1x128xf32, #tpu.memory_space<vmem>>, vector<1x8xf32>
    %21 = vector.shape_cast %20 : vector<1x8xf32> to vector<1x1x8xf32>
    %22 = vector.broadcast %21 : vector<1x1x8xf32> to vector<2x6x8xf32>
    %23 = arith.addf %19, %22 : vector<2x6x8xf32>
    %cst_9 = arith.constant 0.000000e+00 : f32
    %24 = vector.broadcast %cst_9 : f32 to vector<2x6x8xf32>
    %25 = arith.maximumf %23, %24 : vector<2x6x8xf32>
    %cst_10 = arith.constant dense<0xFF800000> : vector<2x8xf32>
    %26 = vector.multi_reduction <maximumf>, %25, %cst_10 [1] : vector<2x6x8xf32> to vector<2x8xf32>
    %27 = tpu.concatenate %14, %26 in 1 : vector<2x8xf32>, vector<2x8xf32> -> vector<2x16xf32>
    %c0_11 = arith.constant 0 : index
    %c40 = arith.constant 40 : index
    %28 = vector.load %arg3[%c0_11, %c40] : memref<32x128xbf16, #tpu.memory_space<vmem>>, vector<16x32xbf16>
    %c0_12 = arith.constant 0 : index
    %c16 = arith.constant 16 : index
    %29 = vector.load %arg4[%c0_12, %c16] : memref<1x128xf32, #tpu.memory_space<vmem>>, vector<1x32xf32>
    %30 = arith.truncf %27 : vector<2x16xf32> to vector<2x16xbf16>
    %cst_13 = arith.constant dense<0.000000e+00> : vector<2x32xf32>
    %31 = tpu.matmul %30, %28, %cst_13 {dimension_numbers = #tpu.dot_dimension_numbers<[1], [0], [0], [1], [0, 0, 1, 1], [], []>} : vector<2x16xbf16>, vector<16x32xbf16>, vector<2x32xf32> -> vector<2x32xf32>
    %32 = vector.broadcast %29 : vector<1x32xf32> to vector<2x32xf32>
    %33 = arith.addf %31, %32 : vector<2x32xf32>
    %34 = math.tanh %33 : vector<2x32xf32>
    %c0_14 = arith.constant 0 : index
    %c72 = arith.constant 72 : index
    %35 = vector.load %arg3[%c0_14, %c72] : memref<32x128xbf16, #tpu.memory_space<vmem>>, vector<32x5xbf16>
    %c0_15 = arith.constant 0 : index
    %c48 = arith.constant 48 : index
    %36 = vector.load %arg4[%c0_15, %c48] : memref<1x128xf32, #tpu.memory_space<vmem>>, vector<1x5xf32>
    %37 = arith.truncf %34 : vector<2x32xf32> to vector<2x32xbf16>
    %cst_16 = arith.constant dense<0.000000e+00> : vector<2x5xf32>
    %38 = tpu.matmul %37, %35, %cst_16 {dimension_numbers = #tpu.dot_dimension_numbers<[1], [0], [0], [1], [0, 0, 1, 1], [], []>} : vector<2x32xbf16>, vector<32x5xbf16>, vector<2x5xf32> -> vector<2x5xf32>
    %39 = vector.broadcast %36 : vector<1x5xf32> to vector<2x5xf32>
    %40 = arith.addf %38, %39 : vector<2x5xf32>
    %cst_17 = arith.constant dense<0xFF800000> : vector<2xf32>
    %41 = vector.multi_reduction <maximumf>, %40, %cst_17 [1] : vector<2x5xf32> to vector<2xf32>
    %42 = vector.shape_cast %41 : vector<2xf32> to vector<2x1xf32>
    %43 = vector.broadcast %42 : vector<2x1xf32> to vector<2x5xf32>
    %44 = arith.subf %40, %43 : vector<2x5xf32>
    %45 = math.exp %44 : vector<2x5xf32>
    %cst_18 = arith.constant dense<0.000000e+00> : vector<2xf32>
    %46 = vector.multi_reduction <add>, %45, %cst_18 [1] : vector<2x5xf32> to vector<2xf32>
    %47 = vector.shape_cast %46 : vector<2xf32> to vector<2x1xf32>
    %48 = vector.broadcast %47 : vector<2x1xf32> to vector<2x5xf32>
    %49 = arith.divf %45, %48 : vector<2x5xf32>
    %50 = vector.extract_strided_slice %49 {offsets = [0, 0], sizes = [2, 1], strides = [1, 1]} : vector<2x5xf32> to vector<2x1xf32>
    %cst_19 = arith.constant 1.000000e+00 : f32
    %51 = vector.broadcast %cst_19 : f32 to vector<2x1xf32>
    %52 = arith.subf %51, %50 : vector<2x1xf32>
    %53 = vector.extract_strided_slice %49 {offsets = [0, 1], sizes = [2, 4], strides = [1, 1]} : vector<2x5xf32> to vector<2x4xf32>
    %c0_20 = arith.constant 0 : index
    %c0_21 = arith.constant 0 : index
    %54 = vector.load %arg2[%c0_20, %c0_21] : memref<2x5xf32, #tpu.memory_space<vmem>>, vector<2x5xf32>
    %cst_22 = arith.constant 0.000000e+00 : f32
    %55 = vector.broadcast %cst_22 : f32 to vector<2x5xf32>
    %56 = arith.subf %55, %54 : vector<2x5xf32>
    %57 = math.exp %56 : vector<2x5xf32>
    %cst_23 = arith.constant 1.000000e+00 : f32
    %58 = vector.broadcast %cst_23 : f32 to vector<2x5xf32>
    %59 = arith.addf %58, %57 : vector<2x5xf32>
    %cst_24 = arith.constant 1.000000e+00 : f32
    %60 = vector.broadcast %cst_24 : f32 to vector<2x5xf32>
    %61 = arith.divf %60, %59 : vector<2x5xf32>
    %62 = vector.extract_strided_slice %61 {offsets = [0, 1], sizes = [2, 4], strides = [1, 1]} : vector<2x5xf32> to vector<2x4xf32>
    %63 = arith.mulf %62, %53 : vector<2x4xf32>
    %cst_25 = arith.constant dense<0.000000e+00> : vector<2xf32>
    %64 = vector.multi_reduction <add>, %63, %cst_25 [1] : vector<2x4xf32> to vector<2xf32>
    %65 = vector.shape_cast %64 : vector<2xf32> to vector<2x1xf32>
    %cst_26 = arith.constant 0.000000e+00 : f32
    %66 = vector.broadcast %cst_26 : f32 to vector<2x85xf32>
    %67 = tpu.concatenate %34, %52, %53, %61, %65, %66 in 1 : vector<2x32xf32>, vector<2x1xf32>, vector<2x4xf32>, vector<2x5xf32>, vector<2x1xf32>, vector<2x85xf32> -> vector<2x128xf32>
    %68 = arith.truncf %67 : vector<2x128xf32> to vector<2x128xbf16>
    %c0_27 = arith.constant 0 : index
    %c0_28 = arith.constant 0 : index
    %69 = vector.load %arg5[%c0_27, %c0_28] : memref<2x128xbf16, #tpu.memory_space<vmem>>, vector<2x128xbf16>
    tpu.vector_store %arg5[%c0_27, %c0_28], %68 {strides = array<i32>} : memref<2x128xbf16, #tpu.memory_space<vmem>>, vector<2x128xbf16>,
    return
  }
  func.func @transform_0(%arg0: i32) -> (i32, i32, i32) {
    %c0_i32 = arith.constant 0 : i32
    %c0_i32_0 = arith.constant 0 : i32
    %c0_i32_1 = arith.constant 0 : i32
    return %arg0, %c0_i32, %c0_i32_0 : i32, i32, i32
  }
  func.func @transform_1(%arg0: i32) -> (i32, i32) {
    %c0_i32 = arith.constant 0 : i32
    %c0_i32_0 = arith.constant 0 : i32
    return %arg0, %c0_i32 : i32, i32
  }
  func.func @transform_2(%arg0: i32) -> (i32, i32) {
    %c0_i32 = arith.constant 0 : i32
    %c0_i32_0 = arith.constant 0 : i32
    %c0_i32_1 = arith.constant 0 : i32
    return %c0_i32, %c0_i32_0 : i32, i32
  }
  func.func @transform_3(%arg0: i32) -> (i32, i32) {
    %c0_i32 = arith.constant 0 : i32
    %c0_i32_0 = arith.constant 0 : i32
    %c0_i32_1 = arith.constant 0 : i32
    return %c0_i32, %c0_i32_0 : i32, i32
  }
  func.func @transform_4(%arg0: i32) -> (i32, i32) {
    %c0_i32 = arith.constant 0 : i32
    %c0_i32_0 = arith.constant 0 : i32
    return %arg0, %c0_i32 : i32, i32
  }
}

</mosaic_0001>

<bundles_post_ra>
// kernel: tpu_custom_call.1
= control target key start
LH: loop header
LB: loop body
LE: loop exit
PB: predicated region body
PF: predicated region fallthrough
CT: control target
= control target key end

     0   :  { %9 = vsyncpa [#allocation3], 0  ;;  %s653_s0 = inlined_call_operand.hbm [shape: bf16[2,8,24], index: 0, kind: input, shape index: {}]   ;;  %s654_s1 = inlined_call_operand.hbm [shape: f32[2,5], index: 1, kind: input, shape index: {}]   ;;  %s655_s2 = inlined_call_operand.hbm [shape: bf16[32,128], index: 2, kind: input, shape index: {}]   ;;  %s656_s3 = inlined_call_operand.vmem [shape: f32[1,128], index: 3, kind: input, shape index: {}]   ;;  %s657_s4 = inlined_call_operand.hbm [shape: bf16[2,128], index: 4, kind: output, shape index: {}]  }
   0x1   :  { %10 = vsyncpa [#allocation6], 0 }
   0x2   :  { %11 = vsyncpa [#allocation4], 0  ;;  %s568_s15 = smov [#allocation5]   ;;  %s569_s17 = smov [#allocation2]  }
   0x3   :  { %s30_s16 = sshll.u32 %s568_s15, 4  ;;  %s17_s18 = sshll.u32 %s569_s17, 4  ;;  %s31_s16 = int_to_ptr.vmem [resolvable:$true] %s30_s16  ;;  %s18_s18 = int_to_ptr.vmem [resolvable:$true] %s17_s18 }
   0x4   :  { %s490_s19 = scalar_lea.vmem %s31_s16, 32  ;;  %p495_p1 = scmp.lt.s32.totalorder %s31_s16, %s31_s16 }
   0x5   :  { %p491_p0 = scmp.ne.s32.totalorder %s31_s16, %s490_s19  ;;  %p496_p2 = scmp.lt.s32.totalorder %s490_s19, %s490_s19 }
   0x7   :  { %p497_p3 = por %p496_p2, %p495_p1 }
   0x9   :  { %p498_p4 = pnand %p497_p3, %p491_p0 }
   0xb   :  { %501 = shalt.err (!%p498_p4)
}
   0xc   :  { %33 = dma.hbm_to_vmem [thread:$0]  %s654_s1, 32, %s31_s16, [#allocation6]  }
   0xd   :  { %s510_s22 = scalar_lea.vmem %s18_s18, 128  ;;  %p515_p6 = scmp.lt.s32.totalorder %s18_s18, %s18_s18 }
   0xe   :  { %p511_p5 = scmp.ne.s32.totalorder %s18_s18, %s510_s22  ;;  %p516_p7 = scmp.lt.s32.totalorder %s510_s22, %s510_s22 }
  0x10   :  { %p517_p8 = por %p516_p7, %p515_p6 }
  0x12   :  { %p518_p9 = pnand %p517_p8, %p511_p5 }
  0x14   :  { %521 = shalt.err (!%p518_p9)
}
  0x15   :  { %s570_s23 = smov 64   ;;  %s571_s24 = smov 4  }
  0x16   :  { %23 = dma.hbm_to_vmem [thread:$0]  %s653_s0, 128, %s18_s18, [#allocation3], %s570_s23, %s570_s23, %s571_s24  }
  0x17   :  { %s572_s27 = smov [#allocation7]  }
  0x18   :  { %s39_s28 = sshll.u32 %s572_s27, 4  ;;  %s40_s28 = int_to_ptr.vmem [resolvable:$true] %s39_s28 }
  0x19   :  { %s530_s29 = scalar_lea.vmem %s40_s28, 256  ;;  %p535_p11 = scmp.lt.s32.totalorder %s40_s28, %s40_s28 }
  0x1a   :  { %p531_p10 = scmp.ne.s32.totalorder %s40_s28, %s530_s29  ;;  %p536_p12 = scmp.lt.s32.totalorder %s530_s29, %s530_s29 }
  0x1c   :  { %p537_p13 = por %p536_p12, %p535_p11 }
  0x1e   :  { %p538_p0 = pnand %p537_p13, %p531_p10 }
  0x20   :  { %541 = shalt.err (!%p538_p0)
}
  0x21   :  { %45 = dma.hbm_to_vmem [thread:$0]  %s655_s2, 256, %s40_s28, [#allocation6], %s570_s23, %s570_s23, %s571_s24  }
  0x22   :  { %562 = dma.done.wait [#allocation3], 128  }
  0x23   :  { %563 = vsyncadd [#allocation3], 4294967168 }
  0x24   :  { %564 = dma.done.wait [#allocation6], 288  }
  0x25   :  { %565 = vsyncadd [#allocation6], 4294967008  ;;  %v573_v0 = vmov 0.0   ;;  %vm574_vm0 = vmmov 0   ;;  %vm81_vm1 = vcmask 1043456   ;;  %v467_v3 = vld [vmem:[#allocation7] sm:$0xff]  }
  0x26   :  { %422 = vmatprep.subr.bf16.mxu0 %v573_v0  ;;  %426 = vmatprep.mubr.msk.bf16.mxu0 %vm574_vm0, %v573_v0  ;;  %v466_v1 = vld [vmem:[#allocation7 + $0x8] ss:$0 sps:$4 sm:$0xff]   ;;  %v468_v4 = vld [vmem:[#allocation2] sm:$0xff]   ;;  %vm77_vm2 = vcmask 195584   ;;  %s575_s0 = smov 112   ;;  %s576_s2 = smov 120  }
  0x27   :  { %430 = vmatprep.subr.bf16.mxu1 %v573_v0  ;;  %432 = vmatprep.mubr.msk.bf16.mxu1 %vm574_vm0, %v573_v0  ;;  %v83_v2 = vsel %vm81_vm1, %v466_v1, 0  ;;  %v633_v13 = vld [vmem:[%s656_s3] ss:$0 sm:$0xff]  ;;  %s577_s7 = smov 8   ;;  %v469_v14 = vld [vmem:[#allocation7] sm:$0xff]   ;;  %s578_s8 = smov 88  }
  0x28   :  { %423 = vmatpush3.bf16.msra.mxu0 %v83_v2  ;;  %vm149_vm3 = vcmask 63488   ;;  %vm181_vm4 = vcmask 193664   ;;  %v470_v48 = vld [vmem:[#allocation7 + $0x8] sm:$0xff]   ;;  %s579_s3 = smov 56   ;;  %vm198_vm5 = vcmask 1041409   ;;  %v471_v1 = vld [vmem:[#allocation7] sm:$0xff]  }
  0x29   :  { %424 = vmatprep.subr.bf16.mxu0 %v573_v0  ;;  %vm207_vm6 = vcmask 64512   ;;  %vm223_vm7 = vcmask 130048   ;;  %s580_s9 = smov 80   ;;  %vm292_vm8 = vcmask 261120   ;;  %vm336_vm9 = vcmask 33792   ;;  %s581_s10 = smov 127  }
  0x2a   :  { %s582_s11 = smov 37   ;;  %vm361_vm10 = vcmask 25600   ;;  %s583_s12 = smov 32   ;;  %vm378_vm11 = vcmask 269312   ;;  %vm380_vm12 = vcmask 302080   ;;  %vm382_vm13 = vcmask 343040  }
  0x2b   :  { %vm384_vm14 = vcmask 351232   ;;  %s584_s13 = smov [#allocation8]  }
  0x2c   :  { %425 = vmatpush3.bf16.msra.mxu0 %v467_v3  ;;  %s394_s14 = sshll.u32 %s584_s13, 4  ;;  %s395_s14 = int_to_ptr.vmem [resolvable:$true] %s394_s14 }
  0x2d   :  { %s542_s15 = scalar_lea.vmem %s395_s14, 16  ;;  %s546_s16 = scalar_lea.vmem %s395_s14, 32 }
  0x2e   :  { %p543_p1 = scmp.ne.s32.totalorder %s395_s14, %s542_s15  ;;  %p547_p2 = scmp.lt.s32.totalorder %s395_s14, %s395_s14 }
  0x2f   :  { %427 = vmatmul.mubr.msk.bf16.vlgmr.msra.gmra.mxu0 %vm77_vm2, %v468_v4  ;;  %p548_p3 = scmp.lt.s32.totalorder %s546_s16, %s542_s15 }
  0x31   :  { %p549_p4 = por %p548_p3, %p547_p2 }
  0x33   :  { %p550_p5 = pnand %p549_p4, %p543_p1 }
  0xef   :  { %v119_v5 = vpop.f32.mrf.mxu0 }
  0xf0   :  { %v164_v6 = vrot.slane %v119_v5, 2  ;;  %v128_v7 = vrot.slane %v119_v5, 1 }
  0xf1   :  { %v428_v8 = vpop.f32.mrf.mxu0 }
  0xf2   :  { %166 = vrot.lane.b32.xlu1 %v164_v6, %s575_s0  ;;  %130 = vrot.lane.b32.xlu0 %v128_v7, %s576_s2 }
  0xf3   :  { %v122_v9 = vpop.f32.mrf.mxu0 }
  0xf4   :  { %v129_v10 = vrot.slane %v122_v9, 1  ;;  %v165_v11 = vrot.slane %v122_v9, 2 }
  0xf5   :  { %v429_v12 = vpop.f32.mrf.mxu0 }
  0xf6   :  { %168 = vrot.lane.b32.xlu1 %v165_v11, %s575_s0  ;;  %132 = vrot.lane.b32.xlu0 %v129_v10, %s576_s2 }
  0xfa   :  { %174 = vrot.lane.b32.xlu0 %v633_v13, %s577_s7 }
  0xfe   :  { %217 = vrot.lane.b32.xlu0 %v469_v14, %s578_s8 }
 0x102   :  { %285 = vrot.lane.b32.xlu0 %v470_v48, %s579_s3 }
 0x106   :  { %289 = vrot.lane.b32.xlu0 %v633_v13, %s580_s9 }
 0x164   :  { %v167_v15 = vpop.permute.xlu1 %166  ;;  %v131_v16 = vpop.permute.xlu0 %130 }
 0x165   :  { %v136_v17 = vadd.f32 %v131_v16, %v119_v5 }
 0x167   :  { %v145_v18 = vadd.f32 %v633_v13, %v136_v17  ;;  %v172_v24 = vadd.f32 %v167_v15, %v136_v17 }
 0x168   :  { %v133_v19 = vpop.permute.xlu0 %132  ;;  %v169_v22 = vpop.permute.xlu1 %168 }
 0x169   :  { %v147_v20 = vmax.f32 %v145_v18, 0.0  ;;  %v137_v21 = vadd.f32 %v133_v19, %v122_v9 }
 0x16b   :  { %v150_v23 = vsel %vm149_vm3, %v147_v20, -inf  ;;  %v146_v25 = vadd.f32 %v633_v13, %v137_v21  ;;  %v173_v26 = vadd.f32 %v169_v22, %v137_v21 }
 0x16c   :  { %v151_v27 = vrot.slane %v150_v23, 4  ;;  %v175_v28 = vpop.permute.xlu0 %174 }
 0x16d   :  { %v148_v29 = vmax.f32 %v146_v25, 0.0  ;;  %v177_v30 = vadd.f32 %v175_v28, %v172_v24  ;;  %v178_v31 = vadd.f32 %v175_v28, %v173_v26  ;;  %v349_v26 = vld [vmem:[#allocation5] sm:$0x3] }
 0x16e   :  { %v152_v32 = vmax.f32 %v150_v23, %v151_v27  ;;  %v350_v27 = vsub.f32 0.0, %v349_v26 }
 0x16f   :  { %v157_v33 = vsel %vm149_vm3, %v148_v29, -inf  ;;  %v179_v34 = vmax.f32 %v177_v30, 0.0  ;;  %v180_v35 = vmax.f32 %v178_v31, 0.0 }
 0x170   :  { %v153_v36 = vrot.slane %v152_v32, 2  ;;  %v158_v37 = vrot.slane %v157_v33, 4  ;;  %v218_v40 = vpop.permute.xlu0 %217  ;;  %v351_v28 = vmul.f32 1.442695, %v350_v27 }
 0x171   :  { %v182_v38 = vsel %vm181_vm4, %v179_v34, -inf  ;;  %v189_v39 = vsel %vm181_vm4, %v180_v35, -inf  ;;  %431 = vmatpush3.bf16.msra.mxu1 %v218_v40 }
 0x172   :  { %v154_v41 = vmax.f32 %v152_v32, %v153_v36  ;;  %v159_v42 = vmax.f32 %v157_v33, %v158_v37  ;;  %v183_v43 = vrot.slane %v182_v38, 4  ;;  %v190_v44 = vrot.slane %v189_v39, 4  ;;  %436 = vmatprep.subr.bf16.mxu1 %v573_v0 }
 0x174   :  { %v160_v45 = vrot.slane %v159_v42, 2  ;;  %v184_v46 = vmax.f32 %v182_v38, %v183_v43  ;;  %v191_v47 = vmax.f32 %v189_v39, %v190_v44  ;;  %v155_v49 = vrot.slane %v154_v41, 1  ;;  %v286_v6 = vpop.permute.xlu0 %285 }
 0x176   :  { %v161_v50 = vmax.f32 %v159_v42, %v160_v45  ;;  %v185_v51 = vrot.slane %v184_v46, 2  ;;  %v192_v52 = vrot.slane %v191_v47, 2  ;;  %v156_v58 = vmax.f32 %v154_v41, %v155_v49 }
 0x178   :  { %v162_v53 = vrot.slane %v161_v50, 1  ;;  %v186_v54 = vmax.f32 %v184_v46, %v185_v51  ;;  %v193_v55 = vmax.f32 %v191_v47, %v192_v52  ;;  %v290_v16 = vpop.permute.xlu0 %289 }
 0x17a   :  { %v187_v56 = vrot.slane %v186_v54, 1  ;;  %v194_v57 = vrot.slane %v193_v55, 1  ;;  %v163_v59 = vmax.f32 %v161_v50, %v162_v53 }
 0x17c   :  { %v188_v60 = vmax.f32 %v186_v54, %v187_v56  ;;  %v195_v61 = vmax.f32 %v193_v55, %v194_v57  ;;  %v199_v62 = vsel %vm198_vm5, %v163_v59, %v156_v58 }
 0x17e   :  { %v203_v63 = vsel %vm198_vm5, %v195_v61, %v188_v60 }
 0x17f   :  { %204 = vrot.lane.b32.xlu1 %v203_v63, %s576_s2 }
 0x183   :  { %220 = vrot.lane.b32.xlu1 %v633_v13, %s575_s0 }
 0x187   :  { %283 = vrot.lane.b32.xlu1 %v471_v1, %s579_s3 }
 0x1f1   :  { %v205_v2 = vpop.permute.xlu1 %204 }
 0x1f2   :  { %v208_v3 = vsel %vm207_vm6, %v199_v62, %v205_v2 }
 0x1f3   :  { %v211_v4 = vpack.c.bf16 %v208_v3, %v208_v3 }
 0x1f5   :  { %433 = vmatmul.mubr.msk.bf16.vlgmr.msra.gmra.mxu1 %vm223_vm7, %v211_v4  ;;  %v221_v5 = vpop.permute.xlu1 %220 }
 0x1f6   :  { %440 = vmatprep.mubr.msk.bf16.mxu1 %vm574_vm0, %v573_v0  ;;  %437 = vmatpush3.bf16.msra.mxu1 %v286_v6 }
 0x1f7   :  { %438 = vmatprep.subr.bf16.mxu1 %v573_v0 }
 0x1f9   :  { %v284_v7 = vpop.permute.xlu1 %283 }
 0x1fa   :  { %439 = vmatpush3.bf16.msra.mxu1 %v284_v7 }
 0x2b5   :  { %v261_v8 = vpop.f32.mrf.mxu1 }
 0x2b6   :  { %v262_v9 = vadd.f32 %v261_v8, %v221_v5 }
 0x2b7   :  { %v434_v10 = vpop.f32.mrf.mxu1 }
 0x2b8   :  { %472 = vtanh.f32 %v262_v9 }
 0x2b9   :  { %v264_v11 = vpop.f32.mrf.mxu1 }
 0x2bb   :  { %v435_v12 = vpop.f32.mrf.mxu1 }
 0x2c5   :  { %v473_v14 = vpop.eup %472 }
 0x2c6   :  { %v272_v15 = vpack.c.bf16 %v473_v14, %v473_v14 }
 0x2c8   :  { %441 = vmatmul.mubr.msk.bf16.vlgmr.msra.gmra.mxu1 %vm292_vm8, %v272_v15 }
 0x388   :  { %v330_v17 = vpop.f32.mrf.mxu1 }
 0x389   :  { %v331_v18 = vadd.f32 %v330_v17, %v290_v16 }
 0x38a   :  { %v442_v0 = vpop.f32.mrf.mxu1 }
 0x38b   :  { %v337_v19 = vsel %vm336_vm9, %v331_v18, -inf }
 0x38c   :  { %v333_v20 = vpop.f32.mrf.mxu1  ;;  %338 = vmax.xlane.f32.xlu1 %v337_v19 }
 0x38e   :  { %v443_v13 = vpop.f32.mrf.mxu1 }
 0x415   :  { %v339_v21 = vpop.xlane.xlu1 %338 }
 0x416   :  { %v340_v22 = vsub.f32 %v331_v18, %v339_v21 }
 0x418   :  { %v341_v23 = vmul.f32 1.442695, %v340_v22 }
 0x41a   :  { %474 = vpow2.f32 %v341_v23 }
 0x41b   :  { %476 = vpow2.f32 %v351_v28 }
 0x427   :  { %v475_v24 = vpop.eup %474 }
 0x428   :  { %v343_v25 = vsel %vm336_vm9, %v475_v24, 0.0  ;;  %v477_v29 = vpop.eup %476 }
 0x429   :  { %344 = vadd.xlane.f32.xlu0 %v343_v25  ;;  %v353_v30 = vadd.f32 1.0, %v477_v29 }
 0x42b   :  { %478 = vrcp.f32 %v353_v30 }
 0x438   :  { %v479_v32 = vpop.eup %478 }
 0x4b2   :  { %v345_v31 = vpop.xlane.xlu0 %344 }
 0x4b3   :  { %480 = vrcp.f32 %v345_v31 }
 0x4c0   :  { %v481_v33 = vpop.eup %480 }
 0x4c1   :  { %v347_v34 = vmul.f32 %v481_v33, %v475_v24 }
 0x4c3   :  { %v356_v35 = vmul.f32 %v479_v32, %v347_v34  ;;  %v348_v38 = vsub.f32 1.0, %v347_v34 }
 0x4c5   :  { %358 = vrot.lane.b32.xlu0 %v356_v35, %s581_s10  ;;  %v461_v39 = vpack.i.bf16 %v347_v34, %v348_v38 }
 0x4c9   :  { %374 = vrot.lane.b32.xlu0 %v479_v32, %s582_s11 }
 0x537   :  { %v359_v36 = vpop.permute.xlu0 %358 }
 0x538   :  { %v362_v37 = vsel %vm361_vm10, %v359_v36, 0.0 }
 0x539   :  { %363 = vadd.xlane.f32.xlu1 %v362_v37 }
 0x53b   :  { %v375_v44 = vpop.permute.xlu0 %374 }
 0x54a   :  { %462 = vrot.lane.b32.xlu1 %v461_v39, %s583_s12 }
 0x5c2   :  { %v364_v40 = vpop.xlane.xlu1 %363 }
 0x5c6   :  { %v463_v41 = vpop.permute.xlu1 %462 }
 0x5c7   :  { %v465_v42 = vunpack.i.h.bf16 %v463_v41  ;;  %v464_v43 = vunpack.i.l.bf16 %v463_v41 }
 0x5c9   :  { %v377_v45 = vsel %vm292_vm8, %v473_v14, %v464_v43 }
 0x5ca   :  { %v379_v46 = vsel %vm378_vm11, %v377_v45, %v465_v42 }
 0x5cb   :  { %v381_v47 = vsel %vm380_vm12, %v379_v46, %v375_v44 }
 0x5cc   :  { %v383_v48 = vsel %vm382_vm13, %v381_v47, %v364_v40 }
 0x5cd   :  { %v385_v49 = vsel %vm384_vm14, %v383_v48, 0.0 }
 0x5ce   :  { %v386_v50 = vpack.c.bf16 %v385_v49, %v385_v49 }
 0x5d0   :  { %387 = vst [vmem:[#allocation8] sm:$0x1] %v386_v50 }
 0x5d1   :  { %553 = shalt.err (!%p550_p5)
}
 0x5d2   :  { %397 = dma.vmem_to_hbm [thread:$0]  %s395_s14, 16, %s657_s4, [#allocation4]  }
 0x5d3   :  { %566 = dma.done.wait [#allocation4], 16  }
 0x5d4   :  { %567 = vsyncadd [#allocation4], 4294967280 }
 0x5d5   :  { %401 = vsyncpa [#allocation3], 1 }
 0x5d6   :  { %402 = vsyncpa [#allocation6], 1 }
 0x5d7   :  { %403 = vsyncpa [#allocation4], 1 }

</bundles_post_ra>
